<compile_context>
chip_gen: v7x
topology: tpu7x:2x2x1
jax: 0.10.0
libtpu: 0.0.40
codegen_flags: <defaults>
</compile_context>

<pallas_src>
import math

import jax
import jax.numpy as jnp
from jax.experimental import pallas as pl
from jax.experimental.pallas import tpu as pltpu


def _get_pad(size: int, multiple: int):
    new_size = math.ceil(size / multiple) * multiple
    pad = new_size - size
    left = pad // 2
    return left, pad - left


def _round_up(x: int, m: int) -> int:
    return (x + m - 1) // m * m


def _padded_slab_bytes(h: int, w: int, dtype) -> int:
    """VMEM bytes of one HxW slab after Mosaic (sublane, 128) padding."""
    itemsize = jnp.dtype(dtype).itemsize
    sublane = max(8, 32 // itemsize)  # 8 for f32, 16 for bf16, 32 for int8
    return _round_up(h, sublane) * _round_up(w, 128) * itemsize


def _choose_c_tile(N: int, C: int, per_channel_bytes: int,
                   budget: int = 2 * 1024 * 1024) -> int:
    """Largest divisor of C whose per-step footprint fits `budget` while
    keeping at least min(4, N*C) grid steps (pipeline depth / 2 TCs)."""
    best = 1
    min_steps = min(4, N * C)
    for ct in range(1, C + 1):
        if C % ct:
            continue
        if ct * per_channel_bytes <= budget and N * (C // ct) >= min_steps:
            best = ct
    return best


def center_padding(x: jax.Array, multiple: int) -> jax.Array:
    """Zero-pads the last two dims of NCHW `x` to multiples of `multiple` (centered)."""
    N, C, H, W = x.shape
    ph_l, ph_r = _get_pad(H, multiple)
    pw_l, pw_r = _get_pad(W, multiple)
    Hn = H + ph_l + ph_r
    Wn = W + pw_l + pw_r

    in_slab = _padded_slab_bytes(H, W, x.dtype)
    out_slab = _padded_slab_bytes(Hn, Wn, x.dtype)
    c_tile = _choose_c_tile(N, C, in_slab + out_slab)
    n_c_blocks = C // c_tile

    def kernel(x_ref, o_ref):
        v = x_ref[...]  # (1, c_tile, H, W)
        dt = o_ref.dtype

        def z(h, w):
            return jnp.zeros((1, c_tile, h, w), dt)

        # Build the padded tile in registers (shift work goes to the XLU,
        # leaving a single unmasked-as-possible full-block store).
        if pw_l or pw_r:
            parts = ([z(H, pw_l)] if pw_l else []) + [v] + \
                    ([z(H, pw_r)] if pw_r else [])
            v = jnp.concatenate(parts, axis=3)
        if ph_l or ph_r:
            parts = ([z(ph_l, Wn)] if ph_l else []) + [v] + \
                    ([z(ph_r, Wn)] if ph_r else [])
            v = jnp.concatenate(parts, axis=2)

        o_ref[...] = v  # single aligned full-block store; interior written once

    # Double-buffered footprint estimate + headroom, clamped to v7x physical.
    vmem_limit = int(min(64 * 1024 * 1024,
                         max(16 * 1024 * 1024,
                             4 * c_tile * (in_slab + out_slab))))

    return pl.pallas_call(
        kernel,
        out_shape=jax.ShapeDtypeStruct((N, C, Hn, Wn), x.dtype),
        grid=(N, n_c_blocks),
        in_specs=[pl.BlockSpec((1, c_tile, H, W), lambda n, c: (n, c, 0, 0))],
        out_specs=pl.BlockSpec((1, c_tile, Hn, Wn), lambda n, c: (n, c, 0, 0)),
        compiler_params=pltpu.CompilerParams(
            dimension_semantics=("parallel", "parallel"),
            vmem_limit_bytes=vmem_limit,
        ),
    )(x)


def center_padding_ref(x: jax.Array, multiple: int) -> jax.Array:
    """Pure-JAX reference mirroring the PyTorch F.pad behavior."""
    _, _, H, W = x.shape
    ph_l, ph_r = _get_pad(H, multiple)
    pw_l, pw_r = _get_pad(W, multiple)
    return jnp.pad(x, ((0, 0), (0, 0), (ph_l, ph_r), (pw_l, pw_r)))


if __name__ == "__main__":
    key = jax.random.PRNGKey(0)
    x = jax.random.normal(key, (2, 4, 16, 16), dtype=jnp.float32)

    # Case 1: multiple=14 (DINOv2 ViT patch size) -> 16 pads to 28 (6 left, 6 right).
    out = jax.block_until_ready(center_padding(x, 14))
    ref = center_padding_ref(x, 14)
    assert out.shape == ref.shape, (out.shape, ref.shape)
    assert jnp.allclose(out, ref), "mismatch vs reference padding (multiple=14)"

    # Case 2: multiple=16 -> already aligned, zero padding (pure-copy path).
    out2 = jax.block_until_ready(center_padding(x, 16))
    ref2 = center_padding_ref(x, 16)
    assert out2.shape == ref2.shape, (out2.shape, ref2.shape)
    assert jnp.allclose(out2, ref2), "mismatch vs reference padding (multiple=16)"

    print("KERNEL_OK")
</pallas_src>

<mosaic_0001>
module attributes {stable_mosaic.version = 11 : i64} {
  func.func @kernel(%arg0: i32, %arg1: i32, %arg2: memref<1x2x16x16xf32, #tpu.memory_space<vmem>>, %arg3: memref<1x2x28x28xf32, #tpu.memory_space<vmem>>) attributes {dimension_semantics = [#tpu.dimension_semantics<parallel>, #tpu.dimension_semantics<parallel>], iteration_bounds = array<i64: 2, 2>, scalar_prefetch = 0 : i64, scratch_operands = 0 : i64, tpu.core_type = #tpu.core_type<tc>, window_params = [{transform_indices = @transform_0, window_bounds = array<i64: 1, 2, 16, 16>}, {transform_indices = @transform_1, window_bounds = array<i64: 1, 2, 28, 28>}]} {
    %c0 = arith.constant 0 : index
    %c0_0 = arith.constant 0 : index
    %c0_1 = arith.constant 0 : index
    %c0_2 = arith.constant 0 : index
    %0 = vector.load %arg2[%c0, %c0_0, %c0_1, %c0_2] : memref<1x2x16x16xf32, #tpu.memory_space<vmem>>, vector<1x2x16x16xf32>
    %cst = arith.constant 0.000000e+00 : f32
    %1 = vector.broadcast %cst : f32 to vector<1x2x16x6xf32>
    %cst_3 = arith.constant 0.000000e+00 : f32
    %2 = vector.broadcast %cst_3 : f32 to vector<1x2x16x6xf32>
    %3 = tpu.concatenate %1, %0, %2 in 3 : vector<1x2x16x6xf32>, vector<1x2x16x16xf32>, vector<1x2x16x6xf32> -> vector<1x2x16x28xf32>
    %cst_4 = arith.constant 0.000000e+00 : f32
    %4 = vector.broadcast %cst_4 : f32 to vector<1x2x6x28xf32>
    %cst_5 = arith.constant 0.000000e+00 : f32
    %5 = vector.broadcast %cst_5 : f32 to vector<1x2x6x28xf32>
    %6 = tpu.concatenate %4, %3, %5 in 2 : vector<1x2x6x28xf32>, vector<1x2x16x28xf32>, vector<1x2x6x28xf32> -> vector<1x2x28x28xf32>
    %c0_6 = arith.constant 0 : index
    %c0_7 = arith.constant 0 : index
    %c0_8 = arith.constant 0 : index
    %c0_9 = arith.constant 0 : index
    %7 = vector.load %arg3[%c0_6, %c0_7, %c0_8, %c0_9] : memref<1x2x28x28xf32, #tpu.memory_space<vmem>>, vector<1x2x28x28xf32>
    tpu.vector_store %arg3[%c0_6, %c0_7, %c0_8, %c0_9], %6 {strides = array<i32>} : memref<1x2x28x28xf32, #tpu.memory_space<vmem>>, vector<1x2x28x28xf32>,
    return
  }
  func.func @transform_0(%arg0: i32, %arg1: i32) -> (i32, i32, i32, i32) {
    %c0_i32 = arith.constant 0 : i32
    %c0_i32_0 = arith.constant 0 : i32
    %c0_i32_1 = arith.constant 0 : i32
    return %arg0, %arg1, %c0_i32, %c0_i32_0 : i32, i32, i32, i32
  }
  func.func @transform_1(%arg0: i32, %arg1: i32) -> (i32, i32, i32, i32) {
    %c0_i32 = arith.constant 0 : i32
    %c0_i32_0 = arith.constant 0 : i32
    %c0_i32_1 = arith.constant 0 : i32
    return %arg0, %arg1, %c0_i32, %c0_i32_0 : i32, i32, i32, i32
  }
}

</mosaic_0001>

<bundles_post_ra>
// kernel: tpu_custom_call.1
= control target key start
LH: loop header
LB: loop body
LE: loop exit
PB: predicated region body
PF: predicated region fallthrough
CT: control target
= control target key end

     0   :  { %6 = vsyncpa [#allocation3], 0  ;;  %s721_s0 = inlined_call_operand.hbm [shape: f32[2,4,16,16], index: 0, kind: input, shape index: {}]   ;;  %s722_s1 = inlined_call_operand.vmem [shape: f32[2,4,28,28], index: 1, kind: output, shape index: {}]  }
   0x1   :  { %8 = vsyncpa [#allocation3 + $0x1], 0  ;;  %s539_s6 = smov 0   ;;  %s541_s7 = smov 0  }
   0x2   :  { %s543_s8 = smov 0   ;;  %s545_s9 = smov 0  }
   0x3   :  { %s547_s10 = smov 0   ;;  %s549_s11 = smov 0  }
   0x4   :  { %s551_s12 = smov 0   ;;  %s553_s13 = smov 0  }
   0x5 LB: > { %s333_s14 = sadd.s32 4294967295, %s522_s13   ;;  %s23_s15 = sadd.s32 1, %s514_s11  ;;  %s522_s13 = sphi %s553_s13, %s14_s13   ;;  %s518_s12 = sphi %s551_s12, %s733_s12   ;;  %s514_s11 = sphi %s549_s11, %s732_s11   ;;  %s510_s10 = sphi %s547_s10, %s731_s10   ;;  %s506_s9 = sphi %s545_s9, %s730_s9   ;;  %s502_s8 = sphi %s543_s8, %s729_s8   ;;  %s498_s7 = sphi %s541_s7, %s728_s7   ;;  %s494_s6 = sphi %s539_s6, %s727_s6  }
   0x6   : > { %p24_p0 = scmp.ge.s32.totalorder %s23_s15, 2  ;;  %s26_s16 = sadd.s32 1, %s518_s12 }
   0x7   : > { %s35_s17 = sadd.s32 1, %s502_s8  ;;  %p42_p1 = scmp.ne.s32.totalorder %s502_s8, %s498_s7 }
   0x8   : > { %s735_s15 = smov (%p24_p0, %s23_s15), 0  ;;  %s737_s16 = smov (!%p24_p0, %s26_s16), %s518_s12 }
   0x9   : > { %s31_s18 = ssub.s32 %s514_s11, %s735_s15  ;;  %p43_p2 = scmp.eq.s32.totalorder %s522_s13, 0 }
   0xa   : > { %p28_p3 = scmp.ge.s32.totalorder %s737_s16, 2  ;;  %p48_p4 = scmp.ne.s32.totalorder %s498_s7, %s494_s6 }
   0xb   : > { %p590_p5 = por %p43_p2, %p42_p1  ;;  %p49_p6 = scmp.eq.s32.totalorder %s333_s14, 0 }
   0xc   : > { %s739_s16 = smov (%p28_p3, %s737_s16), 0  ;;  %p357_p8 = scmp.lt.s32.totalorder %s522_s13, 4 }
   0xd   : > { %p596_p7 = por %p49_p6, %p48_p4  ;;  %s30_s21 = ssub.s32 %s518_s12, %s739_s16 }
   0xe   : > { %s32_s22 = sor.u32 %s31_s18, %s30_s21  ;;  %s100_s23 = sand.u32 1, %s502_s8  }
   0xf   : > { %p33_p9 = scmp.eq.s32.totalorder %s32_s22, 0  ;;  %s337_s24 = sshll.u32 %s100_s23, 5 }
  0x10   : > { %s350_s25 = sshll.u32 %s514_s11, 2  ;;  %s340_s27 = sshll.u32 %s518_s12, 3 }
  0x11   : > { %s606_s26 = scalar_select %p33_p9, %s502_s8, %s35_s17  }
  0x12   : > { %s111_s28 = sadd.s32 %s350_s25, %s340_s27  ;;  %s104_s29 = scalar_lea.vmem [#allocation2], %s337_s24 }
  0x13   : > { %s114_s30 = sshll.u32 %s104_s29, 4  ;;  %s341_s2 = sshll.u32 %s111_s28, 7  ;;  %s609_s30 = int_to_ptr.vmem [resolvable:$true] %s114_s30 }
  0x14   : > { %s614_s5 = scalar_lea.hbm %s721_s0, %s341_s2  ;;  %p620_p10 = pnand %p357_p8, %p590_p5 }
  0x15   : > { %s625_s14 = scalar_lea.sflag [#allocation3], %s100_s23  ;;  %s426_s17 = scalar_lea.hbm %s614_s5, 512 }
  0x16   : > { %p427_p12 = scmp.ne.s32.totalorder %s614_s5, %s426_s17  ;;  %p428_p13 = pneg %p620_p10 }
  0x17   : > { %s431_s21 = scalar_lea.hbm %s721_s0, 2048  ;;  %p432_p2 = scmp.lt.u32.totalorder %s614_s5, %s721_s0 }
  0x18   : > { %p429_p0 = pnand %p428_p13, %p427_p12  ;;  %p433_p3 = scmp.lt.u32.totalorder %s431_s21, %s426_s17 }
  0x19   : > { %p435_p5 = scmp.lt.u32.totalorder %s426_s17, %s614_s5 }
  0x1a   : > { %p430_p1 = pneg %p429_p0  ;;  %p434_p4 = por %p433_p3, %p432_p2 }
  0x1c   : > { %p436_p6 = por %p435_p5, %p434_p4 }
  0x1e   : > { %p437_p8 = pnand %p436_p6, %p430_p1 }
  0x20   : > { %440 = shalt.err (!%p437_p8)
}
  0x21   : > { %s441_s23 = scalar_lea.vmem %s609_s30, 512  ;;  %s524_s25 = smov [#allocation2]  }
  0x22   : > { %p442_p9 = scmp.ne.s32.totalorder %s609_s30, %s441_s23  ;;  %s446_s27 = sshll.u32 %s524_s25, 4  ;;  %s447_s27 = int_to_ptr.vmem [resolvable:$false] %s446_s27 }
  0x23   : > { %s448_s28 = scalar_lea.vmem %s447_s27, 1024  ;;  %p449_p11 = scmp.lt.s32.totalorder %s609_s30, %s447_s27 }
  0x24   : > { %p444_p12 = pnand %p442_p9, %p428_p13  ;;  %p450_p2 = scmp.lt.s32.totalorder %s448_s28, %s441_s23 }
  0x26   : > { %p445_p0 = pneg %p444_p12  ;;  %p451_p3 = por %p450_p2, %p449_p11 }
  0x28   : > { %p452_p4 = pnand %p451_p3, %p445_p0 }
  0x2a   : > { %455 = shalt.err (!%p452_p4)
}
  0x2b   : > { %s525_s29 = smov 128   ;;  %s526_s2 = smov 8  }
  0x2c   : > { %356 = dma.hbm_to_vmem [thread:$0]  (!%p620_p10), %s614_s5, 512, %s609_s30, %s625_s14, %s525_s29, %s525_s29, %s526_s2  }
  0x2d   : > { %p122_p13 = scmp.lt.s32.totalorder %s522_s13, 5  ;;  %p726_p1 = scmp.ge.s32.totalorder %s522_s13, 1 }
  0x2f   : > { %p123_p5 = pnand %p726_p1, %p122_p13 }
  0x30   : > { %s128_s3 = sand.u32 (!%p123_p5), 1, %s498_s7  }
  0x31   : > { %126 = sbr.rel (%p123_p5) target bundleno = 185 (0xb9), region = 24  ;;  %s343_s4 = sshll.u32 (!%p123_p5), %s128_s3, 5 }
  0x32   : > { %s129_s17 = scalar_lea.sflag (!%p123_p5), [#allocation3], %s128_s3  ;;  %s132_s18 = scalar_lea.vmem (!%p123_p5), [#allocation2], %s343_s4 }
  0x38   : > { %489 = dma.done.wait (%p596_p7), %s129_s17, 512  }
  0x39   : > { %491 = vsyncadd (%p596_p7), %s129_s17, 4294966784  ;;  %s344_s6 = sshll.u32 %s506_s9, 1  ;;  %p158_p10 = scmp.lt.s32.totalorder %s510_s10, 1  ;;  %v170_v0 = vld [vmem:[%s132_s18 + $0x10] sm:$0xff]  ;;  %v168_v1 = vld [vmem:[%s132_s18] sm:$0xff]  ;;  %vm223_vm0 = vcmask 224256  }
  0x3a   : > { %p160_p11 = scmp.lt.s32.totalorder %s344_s6, 3  ;;  %s527_s19 = smov 6   ;;  %v171_v2 = vld [vmem:[%s132_s18 + $0x18] sm:$0xff]  ;;  %v169_v3 = vld [vmem:[%s132_s18 + $0x8] sm:$0xff]  ;;  %v528_v4 = vmov 0.0   ;;  %vm188_vm1 = vcmask 48128  }
  0x3b   : > { %s741_s10 = smov (!%p158_p10, %s510_s10), 1  ;;  %180 = vrot.lane.b32.xlu1 %v170_v0, %s527_s19  ;;  %176 = vrot.lane.b32.xlu0 %v168_v1, %s527_s19  ;;  %vm193_vm2 = vcmask 179200   ;;  %vm202_vm3 = vcmask 1045504   ;;  %vm219_vm4 = vcmask 228352  }
  0x3c   : > { %s743_s6 = smov (!%p160_p11, %s344_s6), 3  ;;  %s346_s30 = sshll.u32 %s741_s10, 4 }
  0x3d   : > { %s345_s5 = sshll.u32 %s743_s6, 2 }
  0x3e   : > { %s164_s14 = sadd.s32 %s346_s30, %s345_s5 }
  0x3f   : > { %s347_s21 = sshll.u32 %s164_s14, 3  ;;  %182 = vrot.lane.b32.xlu1 %v171_v2, %s527_s19  ;;  %178 = vrot.lane.b32.xlu0 %v169_v3, %s527_s19 }
  0x40   : > { %s667_s9 = scalar_lea.vmem %s722_s1, %s347_s21 }
  0x41   : > { %224 = vst.msk [vmem:[%s667_s9 + $0x18] sm:$0xf] %vm223_vm0, %v528_v4  ;;  %228 = vst.msk [vmem:[%s667_s9 + $0x38] sm:$0xf] %vm223_vm0, %v528_v4 }
  0xad   : > { %v181_v5 = vpop.permute.xlu1 %180  ;;  %v177_v6 = vpop.permute.xlu0 %176 }
  0xae   : > { %v191_v7 = vsel %vm188_vm1, 0.0, %v181_v5  ;;  %v189_v8 = vsel %vm188_vm1, 0.0, %v177_v6 }
  0xaf   : > { %v196_v9 = vsel %vm193_vm2, %v191_v7, 0.0  ;;  %v194_v10 = vsel %vm193_vm2, %v189_v8, 0.0 }
  0xb0   : > { %v206_v11 = vrot.slane %v196_v9, 2  ;;  %v203_v12 = vrot.slane %v194_v10, 2 }
  0xb1   : > { %v183_v13 = vpop.permute.xlu1 %182  ;;  %v179_v14 = vpop.permute.xlu0 %178 }
  0xb2   : > { %v216_v15 = vsel %vm202_vm3, 0.0, %v206_v11  ;;  %v215_v16 = vsel %vm202_vm3, 0.0, %v203_v12  ;;  %v192_v17 = vsel %vm188_vm1, 0.0, %v183_v13  ;;  %v190_v18 = vsel %vm188_vm1, 0.0, %v179_v14 }
  0xb3   : > { %225 = vst.msk [vmem:[%s667_s9 + $0x20] sm:$0xff] %vm219_vm4, %v216_v15  ;;  %220 = vst.msk [vmem:[%s667_s9] sm:$0xff] %vm219_vm4, %v215_v16  ;;  %v197_v19 = vsel %vm193_vm2, %v192_v17, 0.0  ;;  %v195_v20 = vsel %vm193_vm2, %v190_v18, 0.0 }
  0xb4   : > { %v207_v21 = vrot.slane %v197_v19, 2  ;;  %v204_v22 = vrot.slane %v195_v20, 2 }
  0xb6   : > { %v208_v23 = vsel %vm202_vm3, %v206_v11, %v207_v21  ;;  %v218_v24 = vsel %vm202_vm3, %v207_v21, 0.0  ;;  %v205_v25 = vsel %vm202_vm3, %v203_v12, %v204_v22  ;;  %v217_v26 = vsel %vm202_vm3, %v204_v22, 0.0 }
  0xb7   : > { %226 = vst.msk [vmem:[%s667_s9 + $0x28] sm:$0xff] %vm219_vm4, %v208_v23  ;;  %227 = vst.msk [vmem:[%s667_s9 + $0x30] sm:$0xff] %vm219_vm4, %v218_v24 }
  0xb8   : > { %221 = vst.msk [vmem:[%s667_s9 + $0x8] sm:$0xff] %vm219_vm4, %v205_v25  ;;  %222 = vst.msk [vmem:[%s667_s9 + $0x10] sm:$0xff] %vm219_vm4, %v217_v26 }
  0xb9 PF: > { %s14_s13 = sadd.s32 1, %s522_s13   ;;  %s727_s6 = smov %s498_s7 }
  0xba   : > { %p11_p7 = scmp.ge.s32.totalorder %s14_s13, 6   ;;  %s728_s7 = smov %s502_s8 }
  0xbb   : > { %s729_s8 = smov %s606_s26  ;;  %s730_s9 = smov %s514_s11 }
  0xbc   : > { %s731_s10 = smov %s518_s12  ;;  %s732_s11 = smov %s735_s15 }
  0xbd   : > { %s733_s12 = smov %s739_s16  ;;  %13 = sbr.rel (!%p11_p7) target bundleno = 5 (0x5), region = 64 }
  0xc4   :  { %261 = vsyncpa [#allocation3], 1 }
  0xc5   :  { %263 = vsyncpa [#allocation3 + $0x1], 1 }

</bundles_post_ra>
